<compile_context>
chip_gen: v6e
topology: v6e:2x2x1
jax: 0.10.0
libtpu: 0.0.40
codegen_flags: <defaults>
</compile_context>

<pallas_src>
import jax
import jax.numpy as jnp
from jax.experimental import pallas as pl
from jax.experimental.pallas import tpu as pltpu


def mlp_kernel(x_ref, w1_ref, b1_ref, w2_ref, b2_ref, w3_ref, b3_ref, o_ref):
    # fc1 + relu   (x cast to bf16 in-kernel; f32 accumulation on the MXU)
    x = x_ref[...].astype(jnp.bfloat16)
    h1 = jnp.dot(x, w1_ref[...], preferred_element_type=jnp.float32)
    h1 = jnp.maximum(h1 + b1_ref[...], 0.0)
    # fc2 + relu
    h2 = jnp.dot(h1.astype(jnp.bfloat16), w2_ref[...],
                 preferred_element_type=jnp.float32)
    h2 = jnp.maximum(h2 + b2_ref[...], 0.0)
    # fc3 + sigmoid
    logits = jnp.dot(h2.astype(jnp.bfloat16), w3_ref[...],
                     preferred_element_type=jnp.float32)
    o_ref[...] = jax.nn.sigmoid(logits + b3_ref[...]).astype(o_ref.dtype)


def _tpu_cores_per_chip():
    """2 TensorCores on v7x, 1 on v5e/v6e. Defaults to 1 if unknown (safe)."""
    try:
        kind = jax.devices()[0].device_kind.lower()
    except Exception:
        return 1
    return 2 if ("v7" in kind or "7x" in kind) else 1


def _choose_batch_tile(B, in_dim, cores):
    """Pick a batch tile.

    Invariant: tile == B (single full block) OR (tile % 128 == 0 and tile <= B),
    so the BlockSpec (8,128) rules always hold and partial blocks only appear
    at the tail.
    """
    # Per-row VMEM estimate (bytes): f32 x double-buffered + in-kernel bf16
    # copy of x + f32 h1/h2/logits + bf16 h1/h2 casts.
    per_row = (2 * in_dim * 4) + (in_dim * 2) + (64 + 32 + 4) * 4 + (64 + 32) * 2
    budget = 24 << 20  # conservative vs v7x's 32 MiB scoped VMEM default
    max_tile = max(128, (budget // per_row) // 128 * 128)

    target_steps = cores if (cores > 1 and B >= cores * 128) else 1
    tile = -(-B // target_steps)  # ceil div
    if tile > max_tile:
        return max_tile           # multiple of 128 and <= B here
    if target_steps > 1:
        tile = -(-tile // 128) * 128  # 128-aligned, still <= B (B >= 256 here)
    return tile


def mask_prediction_forward(x, params, *, out_dtype=jnp.float32):
    """x: [B, input_size] float32. params: dict with bf16 w1/w2/w3, f32 b1/b2/b3."""
    B, in_dim = x.shape
    w1, w2, w3 = (params["w1"].astype(jnp.bfloat16),
                  params["w2"].astype(jnp.bfloat16),
                  params["w3"].astype(jnp.bfloat16))
    b1, b2, b3 = params["b1"], params["b2"], params["b3"]
    h1_dim, h2_dim, out_dim = w1.shape[1], w2.shape[1], w3.shape[1]

    cores = _tpu_cores_per_chip()
    tile = _choose_batch_tile(B, in_dim, cores)
    num_steps = pl.cdiv(B, tile)

    return pl.pallas_call(
        mlp_kernel,
        out_shape=jax.ShapeDtypeStruct((B, out_dim), out_dtype),
        grid_spec=pltpu.PrefetchScalarGridSpec(
            num_scalar_prefetch=0,
            grid=(num_steps,),
            in_specs=[
                pl.BlockSpec((tile, in_dim), lambda i: (i, 0)),     # x tile (f32)
                pl.BlockSpec((in_dim, h1_dim), lambda i: (0, 0)),   # w1 (resident)
                pl.BlockSpec((1, h1_dim), lambda i: (0, 0)),        # b1
                pl.BlockSpec((h1_dim, h2_dim), lambda i: (0, 0)),   # w2
                pl.BlockSpec((1, h2_dim), lambda i: (0, 0)),        # b2
                pl.BlockSpec((h2_dim, out_dim), lambda i: (0, 0)),  # w3
                pl.BlockSpec((1, out_dim), lambda i: (0, 0)),       # b3
            ],
            out_specs=pl.BlockSpec((tile, out_dim), lambda i: (i, 0)),
        ),
        compiler_params=pltpu.CompilerParams(
            dimension_semantics=("parallel",)
        ),
    )(x, w1, b1, w2, b2, w3, b3)


def init_params(key, input_size, hidden1=64, hidden2=32, output_size=4):
    """Deterministic synthetic parameters (PyTorch-Linear-like uniform init).

    Weights are stored [in_features, out_features] (transposed vs. nn.Linear)
    so the kernel computes h = x @ W + b directly.
    """
    ks = jax.random.split(key, 6)

    def linear(kw, kb, fan_in, fan_out):
        bound = 1.0 / jnp.sqrt(fan_in)
        w = jax.random.uniform(kw, (fan_in, fan_out), jnp.float32, -bound, bound)
        b = jax.random.uniform(kb, (1, fan_out), jnp.float32, -bound, bound)
        return w, b

    w1, b1 = linear(ks[0], ks[1], input_size, hidden1)
    w2, b2 = linear(ks[2], ks[3], hidden1, hidden2)
    w3, b3 = linear(ks[4], ks[5], hidden2, output_size)
    return {"w1": w1, "b1": b1, "w2": w2, "b2": b2, "w3": w3, "b3": b3}


def prepare_params(params_f32):
    """One-time cast of matmul operands to bf16 (outside the hot path)."""
    return {
        "w1": params_f32["w1"].astype(jnp.bfloat16),
        "w2": params_f32["w2"].astype(jnp.bfloat16),
        "w3": params_f32["w3"].astype(jnp.bfloat16),
        "b1": params_f32["b1"], "b2": params_f32["b2"], "b3": params_f32["b3"],
    }


def _reference_bf16(x, params):
    """Pure-JAX reference with the same precision policy as the kernel."""
    h = jnp.dot(x.astype(jnp.bfloat16), params["w1"].astype(jnp.bfloat16),
                preferred_element_type=jnp.float32)
    h = jnp.maximum(h + params["b1"], 0.0)
    h = jnp.dot(h.astype(jnp.bfloat16), params["w2"].astype(jnp.bfloat16),
                preferred_element_type=jnp.float32)
    h = jnp.maximum(h + params["b2"], 0.0)
    h = jnp.dot(h.astype(jnp.bfloat16), params["w3"].astype(jnp.bfloat16),
                preferred_element_type=jnp.float32)
    return jax.nn.sigmoid(h + params["b3"])


def _reference_f32(x, params_f32):
    """Full-f32 reference matching the PyTorch module exactly."""
    h = jnp.maximum(jnp.dot(x, params_f32["w1"]) + params_f32["b1"], 0.0)
    h = jnp.maximum(jnp.dot(h, params_f32["w2"]) + params_f32["b2"], 0.0)
    return jax.nn.sigmoid(jnp.dot(h, params_f32["w3"]) + params_f32["b3"])


if __name__ == "__main__":
    key = jax.random.PRNGKey(0)
    k_params, k_x1, k_x2 = jax.random.split(key, 3)

    input_size = 32  # synthetic stand-in for checkpoint['input_size']
    params_f32 = init_params(k_params, input_size)
    params = prepare_params(params_f32)

    # Tiny batch (matches the checkpoint's batch=2): single full-batch block.
    x_small = jax.random.normal(k_x1, (2, input_size), dtype=jnp.float32)
    out_small = jax.block_until_ready(mask_prediction_forward(x_small, params))
    assert out_small.shape == (2, 4)
    assert jnp.allclose(out_small, _reference_bf16(x_small, params_f32), atol=2e-3), \
        "small-batch mismatch vs bf16-policy reference"
    assert jnp.allclose(out_small, _reference_f32(x_small, params_f32), atol=2e-2), \
        "small-batch mismatch vs f32 reference (bf16 policy drift too large)"

    # Ragged batch: exercises 128-aligned tiling and the masked partial block
    # (no jnp.pad / output slice on this path).
    x_big = jax.random.normal(k_x2, (300, input_size), dtype=jnp.float32)
    out_big = jax.block_until_ready(mask_prediction_forward(x_big, params))
    assert out_big.shape == (300, 4)
    assert jnp.allclose(out_big, _reference_bf16(x_big, params_f32), atol=2e-3), \
        "ragged-batch mismatch vs bf16-policy reference"
    assert jnp.allclose(out_big, _reference_f32(x_big, params_f32), atol=2e-2), \
        "ragged-batch mismatch vs f32 reference (bf16 policy drift too large)"

    print("KERNEL_OK")
</pallas_src>

<mosaic_0001>
module attributes {stable_mosaic.version = 11 : i64} {
  func.func @mlp_kernel(%arg0: i32, %arg1: memref<2x32xf32, #tpu.memory_space<vmem>>, %arg2: memref<32x64xbf16, #tpu.memory_space<vmem>>, %arg3: memref<1x64xf32, #tpu.memory_space<vmem>>, %arg4: memref<64x32xbf16, #tpu.memory_space<vmem>>, %arg5: memref<1x32xf32, #tpu.memory_space<vmem>>, %arg6: memref<32x4xbf16, #tpu.memory_space<vmem>>, %arg7: memref<1x4xf32, #tpu.memory_space<vmem>>, %arg8: memref<2x4xf32, #tpu.memory_space<vmem>>) attributes {dimension_semantics = [#tpu.dimension_semantics<parallel>], iteration_bounds = array<i64: 1>, scalar_prefetch = 0 : i64, scratch_operands = 0 : i64, tpu.core_type = #tpu.core_type<tc>, window_params = [{transform_indices = @transform_0, window_bounds = array<i64: 2, 32>}, {pipeline_mode = #tpu.pipeline_mode<synchronous>, transform_indices = @transform_1, window_bounds = array<i64: 32, 64>}, {pipeline_mode = #tpu.pipeline_mode<synchronous>, transform_indices = @transform_2, window_bounds = array<i64: 1, 64>}, {pipeline_mode = #tpu.pipeline_mode<synchronous>, transform_indices = @transform_3, window_bounds = array<i64: 64, 32>}, {pipeline_mode = #tpu.pipeline_mode<synchronous>, transform_indices = @transform_4, window_bounds = array<i64: 1, 32>}, {pipeline_mode = #tpu.pipeline_mode<synchronous>, transform_indices = @transform_5, window_bounds = array<i64: 32, 4>}, {pipeline_mode = #tpu.pipeline_mode<synchronous>, transform_indices = @transform_6, window_bounds = array<i64: 1, 4>}, {transform_indices = @transform_7, window_bounds = array<i64: 2, 4>}]} {
    %c0 = arith.constant 0 : index
    %c0_0 = arith.constant 0 : index
    %0 = vector.load %arg1[%c0, %c0_0] : memref<2x32xf32, #tpu.memory_space<vmem>>, vector<2x32xf32>
    %1 = arith.truncf %0 : vector<2x32xf32> to vector<2x32xbf16>
    %c0_1 = arith.constant 0 : index
    %c0_2 = arith.constant 0 : index
    %2 = vector.load %arg2[%c0_1, %c0_2] : memref<32x64xbf16, #tpu.memory_space<vmem>>, vector<32x64xbf16>
    %cst = arith.constant dense<0.000000e+00> : vector<2x64xf32>
    %3 = tpu.matmul %1, %2, %cst {dimension_numbers = #tpu.dot_dimension_numbers<[1], [0], [0], [1], [0, 0, 1, 1], [], []>} : vector<2x32xbf16>, vector<32x64xbf16>, vector<2x64xf32> -> vector<2x64xf32>
    %c0_3 = arith.constant 0 : index
    %c0_4 = arith.constant 0 : index
    %4 = vector.load %arg3[%c0_3, %c0_4] : memref<1x64xf32, #tpu.memory_space<vmem>>, vector<1x64xf32>
    %5 = vector.broadcast %4 : vector<1x64xf32> to vector<2x64xf32>
    %6 = arith.addf %3, %5 : vector<2x64xf32>
    %cst_5 = arith.constant 0.000000e+00 : f32
    %7 = vector.broadcast %cst_5 : f32 to vector<2x64xf32>
    %8 = arith.maximumf %6, %7 : vector<2x64xf32>
    %9 = arith.truncf %8 : vector<2x64xf32> to vector<2x64xbf16>
    %c0_6 = arith.constant 0 : index
    %c0_7 = arith.constant 0 : index
    %10 = vector.load %arg4[%c0_6, %c0_7] : memref<64x32xbf16, #tpu.memory_space<vmem>>, vector<64x32xbf16>
    %cst_8 = arith.constant dense<0.000000e+00> : vector<2x32xf32>
    %11 = tpu.matmul %9, %10, %cst_8 {dimension_numbers = #tpu.dot_dimension_numbers<[1], [0], [0], [1], [0, 0, 1, 1], [], []>} : vector<2x64xbf16>, vector<64x32xbf16>, vector<2x32xf32> -> vector<2x32xf32>
    %c0_9 = arith.constant 0 : index
    %c0_10 = arith.constant 0 : index
    %12 = vector.load %arg5[%c0_9, %c0_10] : memref<1x32xf32, #tpu.memory_space<vmem>>, vector<1x32xf32>
    %13 = vector.broadcast %12 : vector<1x32xf32> to vector<2x32xf32>
    %14 = arith.addf %11, %13 : vector<2x32xf32>
    %cst_11 = arith.constant 0.000000e+00 : f32
    %15 = vector.broadcast %cst_11 : f32 to vector<2x32xf32>
    %16 = arith.maximumf %14, %15 : vector<2x32xf32>
    %17 = arith.truncf %16 : vector<2x32xf32> to vector<2x32xbf16>
    %c0_12 = arith.constant 0 : index
    %c0_13 = arith.constant 0 : index
    %18 = vector.load %arg6[%c0_12, %c0_13] : memref<32x4xbf16, #tpu.memory_space<vmem>>, vector<32x4xbf16>
    %cst_14 = arith.constant dense<0.000000e+00> : vector<2x4xf32>
    %19 = tpu.matmul %17, %18, %cst_14 {dimension_numbers = #tpu.dot_dimension_numbers<[1], [0], [0], [1], [0, 0, 1, 1], [], []>} : vector<2x32xbf16>, vector<32x4xbf16>, vector<2x4xf32> -> vector<2x4xf32>
    %c0_15 = arith.constant 0 : index
    %c0_16 = arith.constant 0 : index
    %20 = vector.load %arg7[%c0_15, %c0_16] : memref<1x4xf32, #tpu.memory_space<vmem>>, vector<1x4xf32>
    %21 = vector.broadcast %20 : vector<1x4xf32> to vector<2x4xf32>
    %22 = arith.addf %19, %21 : vector<2x4xf32>
    %23 = arith.negf %22 : vector<2x4xf32>
    %24 = math.exp %23 : vector<2x4xf32>
    %cst_17 = arith.constant 1.000000e+00 : f32
    %25 = vector.broadcast %cst_17 : f32 to vector<2x4xf32>
    %26 = arith.addf %25, %24 : vector<2x4xf32>
    %27 = arith.divf %25, %26 : vector<2x4xf32>
    %c0_18 = arith.constant 0 : index
    %c0_19 = arith.constant 0 : index
    %28 = vector.load %arg8[%c0_18, %c0_19] : memref<2x4xf32, #tpu.memory_space<vmem>>, vector<2x4xf32>
    tpu.vector_store %arg8[%c0_18, %c0_19], %27 {strides = array<i32>} : memref<2x4xf32, #tpu.memory_space<vmem>>, vector<2x4xf32>,
    return
  }
  func.func @transform_0(%arg0: i32) -> (i32, i32) {
    %c0_i32 = arith.constant 0 : i32
    %c0_i32_0 = arith.constant 0 : i32
    return %arg0, %c0_i32 : i32, i32
  }
  func.func @transform_1(%arg0: i32) -> (i32, i32) {
    %c0_i32 = arith.constant 0 : i32
    %c0_i32_0 = arith.constant 0 : i32
    %c0_i32_1 = arith.constant 0 : i32
    return %c0_i32, %c0_i32_0 : i32, i32
  }
  func.func @transform_2(%arg0: i32) -> (i32, i32) {
    %c0_i32 = arith.constant 0 : i32
    %c0_i32_0 = arith.constant 0 : i32
    %c0_i32_1 = arith.constant 0 : i32
    return %c0_i32, %c0_i32_0 : i32, i32
  }
  func.func @transform_3(%arg0: i32) -> (i32, i32) {
    %c0_i32 = arith.constant 0 : i32
    %c0_i32_0 = arith.constant 0 : i32
    %c0_i32_1 = arith.constant 0 : i32
    return %c0_i32, %c0_i32_0 : i32, i32
  }
  func.func @transform_4(%arg0: i32) -> (i32, i32) {
    %c0_i32 = arith.constant 0 : i32
    %c0_i32_0 = arith.constant 0 : i32
    %c0_i32_1 = arith.constant 0 : i32
    return %c0_i32, %c0_i32_0 : i32, i32
  }
  func.func @transform_5(%arg0: i32) -> (i32, i32) {
    %c0_i32 = arith.constant 0 : i32
    %c0_i32_0 = arith.constant 0 : i32
    %c0_i32_1 = arith.constant 0 : i32
    return %c0_i32, %c0_i32_0 : i32, i32
  }
  func.func @transform_6(%arg0: i32) -> (i32, i32) {
    %c0_i32 = arith.constant 0 : i32
    %c0_i32_0 = arith.constant 0 : i32
    %c0_i32_1 = arith.constant 0 : i32
    return %c0_i32, %c0_i32_0 : i32, i32
  }
  func.func @transform_7(%arg0: i32) -> (i32, i32) {
    %c0_i32 = arith.constant 0 : i32
    %c0_i32_0 = arith.constant 0 : i32
    return %arg0, %c0_i32 : i32, i32
  }
}

</mosaic_0001>

<bundles_post_ra>
// kernel: tpu_custom_call.1
= control target key start
LH: loop header
LB: loop body
LE: loop exit
PB: predicated region body
PF: predicated region fallthrough
CT: control target
= control target key end

     0   :  { %v363_v1 = vmov 0.0   ;;  %vm364_vm0 = vmmov 0   ;;  %vm53_vm1 = vcmask 261120   ;;  %s450_s0 = inlined_call_operand.vmem [shape: f32[2,32], index: 0, kind: input, shape index: {}]   ;;  %s451_s1 = inlined_call_operand.vmem [shape: bf16[32,64], index: 1, kind: input, shape index: {}]   ;;  %s452_s2 = inlined_call_operand.vmem [shape: f32[1,64], index: 2, kind: input, shape index: {}]   ;;  %s453_s3 = inlined_call_operand.vmem [shape: bf16[64,32], index: 3, kind: input, shape index: {}]   ;;  %s454_s4 = inlined_call_operand.vmem [shape: f32[1,32], index: 4, kind: input, shape index: {}]   ;;  %s455_s5 = inlined_call_operand.vmem [shape: bf16[32,4], index: 5, kind: input, shape index: {}]   ;;  %s456_s6 = inlined_call_operand.vmem [shape: f32[1,4], index: 6, kind: input, shape index: {}]   ;;  %s457_s7 = inlined_call_operand.hbm [shape: f32[2,4], index: 7, kind: output, shape index: {}]  }
   0x1   :  { %v329_v0 = vld [vmem:[%s451_s1 + $0x8] sm:$0xff]   ;;  %298 = vmatprep.subr.bf16.mxu0 %v363_v1  ;;  %v330_v2 = vld [vmem:[%s451_s1] sm:$0xff]   ;;  %306 = vmatprep.subr.bf16.mxu1 %v363_v1  ;;  %v331_v4 = vld [vmem:[%s453_s3 + $0x18] sm:$0xff]  }
   0x2   :  { %299 = vmatpush3.bf16.msra.mxu0 %v329_v0  ;;  %302 = vmatprep.mubr.msk.bf16.mxu0 %vm364_vm0, %v363_v1  ;;  %v28_v3 = vld [vmem:[%s450_s0] sm:$0x3]  ;;  %v332_v5 = vld [vmem:[%s453_s3 + $0x10] sm:$0xff]  }
   0x3   :  { %300 = vmatprep.subr.bf16.mxu0 %v363_v1  ;;  %314 = vmatprep.mubr.msk.bf16.mxu1 %vm364_vm0, %v363_v1  ;;  %v29_v6 = vpack.c.bf16 %v28_v3, %v28_v3 }
   0x4   :  { %307 = vmatpush3.bf16.msra.mxu1 %v331_v4 }
   0x5   :  { %308 = vmatprep.subr.bf16.mxu1 %v363_v1 }
   0x6   :  { %301 = vmatpush3.bf16.msra.mxu0 %v330_v2 }
   0x7   :  { %318 = vmatprep.subr.bf16.mxu0 %v363_v1 }
   0x8   :  { %12 = vsyncpa [#allocation3], 0  ;;  %309 = vmatpush3.bf16.msra.mxu1 %v332_v5  ;;  %v333_v7 = vld [vmem:[%s453_s3 + $0x8] sm:$0xff]   ;;  %v334_v8 = vld [vmem:[%s453_s3] sm:$0xff]   ;;  %vm138_vm2 = vcmask 523264   ;;  %vm256_vm3 = vcmask 25600  }
   0x9   :  { %303 = vmatmul.mubr.msk.bf16.vlgmr.msra.gmra.mxu0 %vm53_vm1, %v29_v6  ;;  %310 = vmatprep.subr.bf16.mxu1 %v363_v1  ;;  %v335_v9 = vld [vmem:[%s455_s5 + $0x8] sm:$0xff]   ;;  %v272_v10 = vld [vmem:[%s452_s2] ss:$0 sm:$0xff] }
   0xa   :  { %322 = vmatprep.mubr.msk.bf16.mxu0 %vm364_vm0, %v363_v1  ;;  %319 = vmatpush3.bf16.msra.mxu0 %v335_v9  ;;  %v336_v18 = vld [vmem:[%s455_s5] sm:$0xff]  }
   0xb   :  { %320 = vmatprep.subr.bf16.mxu0 %v363_v1  ;;  %v276_v19 = vld [vmem:[%s454_s4] ss:$0 sm:$0xff]  ;;  %s365_s4 = smov [#allocation2]  }
   0xc   :  { %311 = vmatpush3.bf16.msra.mxu1 %v333_v7  ;;  %v282_v27 = vld [vmem:[%s456_s6] ss:$0 sm:$0xff]  ;;  %s264_s5 = sshll.u32 %s365_s4, 4  ;;  %s265_s5 = int_to_ptr.vmem [resolvable:$true] %s264_s5 }
   0xd   :  { %312 = vmatprep.subr.bf16.mxu1 %v363_v1  ;;  %s341_s21 = scalar_lea.vmem %s265_s5, 32  ;;  %p346_p1 = scmp.lt.s32.totalorder %s265_s5, %s265_s5 }
   0xe   :  { %321 = vmatpush3.bf16.msra.mxu0 %v336_v18  ;;  %p342_p0 = scmp.ne.s32.totalorder %s265_s5, %s341_s21  ;;  %p347_p2 = scmp.lt.s32.totalorder %s341_s21, %s341_s21 }
  0x10   :  { %313 = vmatpush3.bf16.msra.mxu1 %v334_v8  ;;  %p348_p3 = por %p347_p2, %p346_p1 }
  0x12   :  { %p349_p4 = pnand %p348_p3, %p342_p0 }
  0xc9   :  { %v91_v11 = vpop.f32.mrf.mxu0 }
  0xca   :  { %v92_v12 = vadd.f32 %v272_v10, %v91_v11 }
  0xcb   :  { %v304_v13 = vpop.f32.mrf.mxu0 }
  0xcc   :  { %v97_v14 = vmax.f32 %v92_v12, 0.0 }
  0xcd   :  { %v94_v15 = vpop.f32.mrf.mxu0 }
  0xce   :  { %v98_v16 = vpack.c.bf16 %v97_v14, %v97_v14 }
  0xcf   :  { %v305_v17 = vpop.f32.mrf.mxu0 }
  0xd0   :  { %315 = vmatmul.mubr.msk.bf16.vlgmr.msra.gmra.mxu1 %vm138_vm2, %v98_v16 }
 0x190   :  { %v176_v20 = vpop.f32.mrf.mxu1 }
 0x191   :  { %v177_v21 = vadd.f32 %v276_v19, %v176_v20 }
 0x192   :  { %v316_v22 = vpop.f32.mrf.mxu1 }
 0x193   :  { %v182_v23 = vmax.f32 %v177_v21, 0.0 }
 0x194   :  { %v179_v24 = vpop.f32.mrf.mxu1 }
 0x195   :  { %v183_v25 = vpack.c.bf16 %v182_v23, %v182_v23 }
 0x196   :  { %v317_v26 = vpop.f32.mrf.mxu1 }
 0x197   :  { %323 = vmatmul.mubr.msk.bf16.vlgmr.msra.gmra.mxu0 %vm53_vm1, %v183_v25 }
 0x257   :  { %v244_v28 = vpop.f32.mrf.mxu0 }
 0x258   :  { %v245_v29 = vadd.f32 %v282_v27, %v244_v28 }
 0x259   :  { %v324_v30 = vpop.f32.mrf.mxu0 }
 0x25a   :  { %v286_v31 = vmul.f32 -1.442695, %v245_v29 }
 0x25b   :  { %v247_v32 = vpop.f32.mrf.mxu0 }
 0x25c   :  { %337 = vpow2.f32 %v286_v31 }
 0x25d   :  { %v325_v33 = vpop.f32.mrf.mxu0 }
 0x269   :  { %v338_v34 = vpop.eup %337 }
 0x26a   :  { %v253_v35 = vadd.f32 1.0, %v338_v34 }
 0x26c   :  { %339 = vrcp.f32 %v253_v35 }
 0x279   :  { %v340_v36 = vpop.eup %339 }
 0x27a   :  { %257 = vst.msk [vmem:[#allocation2] sm:$0x3] %vm256_vm3, %v340_v36 }
 0x27b   :  { %352 = shalt.err (!%p349_p4)
}
 0x27c   :  { %267 = dma.vmem_to_hbm [thread:$0]  %s265_s5, 32, %s457_s7, [#allocation3]  }
 0x27d   :  { %361 = dma.done.wait [#allocation3], 32  }
 0x27e   :  { %362 = vsyncadd [#allocation3], 4294967264 }
 0x27f   :  { %271 = vsyncpa [#allocation3], 1 }

</bundles_post_ra>
